<compile_context>
chip_gen: v7x
topology: tpu7x:2x2x1
jax: 0.10.0
libtpu: 0.0.40
codegen_flags: <defaults>
</compile_context>

<pallas_src>
import functools

import jax
import jax.numpy as jnp
import numpy as np
from jax.experimental import pallas as pl
from jax.experimental.pallas import tpu as pltpu


def _round_up(n, m):
    return ((n + m - 1) // m) * m


def _deepskip_kernel(x_ref, wx_ref, b_ref, ws_ref, wo_ref, out_ref, *, B, D_rp):
    # x_ref:   (1, Dp)         padded input vector (f32)
    # wx_ref:  (Dp, B*D_rp)    concatenated x-path inner weights, (in, out) layout
    # b_ref:   (1, B*D_rp)     concatenated inner biases
    # ws_ref:  (B, Dp, D_rp)   state-path inner weights, (in, out) layout
    # wo_ref:  (B, D_rp, Dp)   outer weights, (in, out) layout
    # out_ref: (1, Dp)
    x = x_ref[...]

    # Hoisted off the serial chain: one lane-dense matmul + bias covers the
    # x-contribution of all B blocks at once.
    pre_x = jnp.dot(x, wx_ref[...], preferred_element_type=jnp.float32) + b_ref[...]

    # Running state stays in f32 vregs; out_ref is written exactly once at the end.
    state = x
    for i in range(B):  # static unroll: B is small and all weights are VMEM-resident
        pre = pre_x[:, i * D_rp:(i + 1) * D_rp] + jnp.dot(
            state, ws_ref[i], preferred_element_type=jnp.float32
        )
        h = jnp.tanh(pre)
        state = state + jnp.dot(h, wo_ref[i], preferred_element_type=jnp.float32)

    out_ref[...] = state.astype(out_ref.dtype)


def deepskip_prepare_params(w_in, b_in, w_out):
    """One-time parameter preprocessing (do at parameter-load time, not per forward).

    w_in:  (B, D_r, 2D)  PyTorch Linear weight, (out, in) layout
    b_in:  (B, D_r)
    w_out: (B, D, D_r)   PyTorch Linear weight, (out, in) layout
    Returns a tuple of arrays ready for the kernel.
    """
    B, D_r, twoD = w_in.shape
    D = twoD // 2
    Dp = _round_up(D, 128)
    D_rp = _round_up(D_r, 128)
    f32 = jnp.float32

    # Split inner weight into x-path and state-path halves; move to (in, out) layout.
    w_x = jnp.transpose(w_in[:, :, :D], (0, 2, 1)).astype(f32)   # (B, D, D_r)
    w_s = jnp.transpose(w_in[:, :, D:], (0, 2, 1)).astype(f32)   # (B, D, D_r)
    w_o = jnp.transpose(w_out, (0, 2, 1)).astype(f32)            # (B, D_r, D)

    # Zero-pad to lane-dense (multiple of 128) tiles. Padded rows/cols are zero so the
    # padded lanes of the state / pre-activation remain exactly zero throughout.
    w_x = jnp.pad(w_x, ((0, 0), (0, Dp - D), (0, D_rp - D_r)))
    w_s = jnp.pad(w_s, ((0, 0), (0, Dp - D), (0, D_rp - D_r)))
    w_o = jnp.pad(w_o, ((0, 0), (0, D_rp - D_r), (0, Dp - D)))
    b = jnp.pad(b_in.astype(f32), ((0, 0), (0, D_rp - D_r)))      # (B, D_rp)

    # Flatten the x-path weights/bias so the x contribution is ONE lane-dense matmul.
    wx_flat = jnp.transpose(w_x, (1, 0, 2)).reshape(Dp, B * D_rp)  # (Dp, B*D_rp)
    b_flat = b.reshape(1, B * D_rp)                                # (1, B*D_rp)

    return (wx_flat, b_flat, w_s, w_o)


def deepskip_forward(x, params):
    """x: (D,); params from deepskip_prepare_params."""
    wx_flat, b_flat, w_s, w_o = params
    B, Dp, D_rp = w_s.shape
    D = x.shape[-1]

    x_pad = jnp.pad(x.astype(jnp.float32).reshape(1, D), ((0, 0), (0, Dp - D)))

    kernel = functools.partial(_deepskip_kernel, B=B, D_rp=D_rp)

    out = pl.pallas_call(
        kernel,
        out_shape=jax.ShapeDtypeStruct((1, Dp), jnp.float32),
        grid_spec=pltpu.PrefetchScalarGridSpec(
            num_scalar_prefetch=0,
            grid=(1,),  # single invocation: all weights (~hundreds of KB) fit in VMEM
            in_specs=[
                pl.BlockSpec((1, Dp), lambda i: (0, 0)),
                pl.BlockSpec((Dp, B * D_rp), lambda i: (0, 0)),
                pl.BlockSpec((1, B * D_rp), lambda i: (0, 0)),
                pl.BlockSpec((B, Dp, D_rp), lambda i: (0, 0, 0)),
                pl.BlockSpec((B, D_rp, Dp), lambda i: (0, 0, 0)),
            ],
            out_specs=pl.BlockSpec((1, Dp), lambda i: (0, 0)),
        ),
        compiler_params=pltpu.CompilerParams(
            dimension_semantics=("arbitrary",),
        ),
    )(x_pad, wx_flat, b_flat, w_s, w_o)

    return out[0, :D].astype(x.dtype)


def deepskip_reference(x, w_in, b_in, w_out):
    """Pure-JAX reference mirroring the PyTorch forward."""
    B = w_in.shape[0]
    state = x
    for i in range(B):
        y = jnp.concatenate([x, state], axis=-1)     # (2D,)
        h = jnp.tanh(y @ w_in[i].T + b_in[i])         # (D_r,)
        state = state + h @ w_out[i].T                # (D,)
    return state


if __name__ == "__main__":
    D, D_r, B = 32, 64, 4

    key = jax.random.PRNGKey(0)
    kx, kwi, kbi, kwo = jax.random.split(key, 4)

    # Deterministic synthetic parameters (PyTorch Linear shapes: (out, in)).
    x = jax.random.normal(kx, (D,), dtype=jnp.float32)
    w_in = jax.random.normal(kwi, (B, D_r, 2 * D), dtype=jnp.float32) * (1.0 / np.sqrt(2 * D))
    b_in = jax.random.normal(kbi, (B, D_r), dtype=jnp.float32) * 0.1
    w_out = jax.random.normal(kwo, (B, D, D_r), dtype=jnp.float32) * (1.0 / np.sqrt(D_r))

    params = deepskip_prepare_params(w_in, b_in, w_out)  # one-time, off the hot path
    fwd = jax.jit(deepskip_forward)

    out = jax.block_until_ready(fwd(x, params))

    ref = deepskip_reference(x, w_in, b_in, w_out)
    np.testing.assert_allclose(np.asarray(out), np.asarray(ref), rtol=1e-5, atol=1e-5)

    print("KERNEL_OK")
</pallas_src>

<mosaic_0001>
module attributes {stable_mosaic.version = 11 : i64} {
  func.func @_deepskip_kernel(%arg0: i32, %arg1: memref<1x128xf32, #tpu.memory_space<vmem>>, %arg2: memref<128x512xf32, #tpu.memory_space<vmem>>, %arg3: memref<1x512xf32, #tpu.memory_space<vmem>>, %arg4: memref<4x128x128xf32, #tpu.memory_space<vmem>>, %arg5: memref<4x128x128xf32, #tpu.memory_space<vmem>>, %arg6: memref<1x128xf32, #tpu.memory_space<vmem>>) attributes {dimension_semantics = [#tpu.dimension_semantics<arbitrary>], iteration_bounds = array<i64: 1>, scalar_prefetch = 0 : i64, scratch_operands = 0 : i64, tpu.core_type = #tpu.core_type<tc>, window_params = [{pipeline_mode = #tpu.pipeline_mode<synchronous>, transform_indices = @transform_0, window_bounds = array<i64: 1, 128>}, {pipeline_mode = #tpu.pipeline_mode<synchronous>, transform_indices = @transform_1, window_bounds = array<i64: 128, 512>}, {pipeline_mode = #tpu.pipeline_mode<synchronous>, transform_indices = @transform_2, window_bounds = array<i64: 1, 512>}, {pipeline_mode = #tpu.pipeline_mode<synchronous>, transform_indices = @transform_3, window_bounds = array<i64: 4, 128, 128>}, {pipeline_mode = #tpu.pipeline_mode<synchronous>, transform_indices = @transform_4, window_bounds = array<i64: 4, 128, 128>}, {pipeline_mode = #tpu.pipeline_mode<synchronous>, transform_indices = @transform_5, window_bounds = array<i64: 1, 128>}]} {
    %c0 = arith.constant 0 : index
    %c0_0 = arith.constant 0 : index
    %0 = vector.load %arg1[%c0, %c0_0] : memref<1x128xf32, #tpu.memory_space<vmem>>, vector<1x128xf32>
    %c0_1 = arith.constant 0 : index
    %c0_2 = arith.constant 0 : index
    %1 = vector.load %arg2[%c0_1, %c0_2] : memref<128x512xf32, #tpu.memory_space<vmem>>, vector<128x512xf32>
    %cst = arith.constant dense<0.000000e+00> : vector<1x512xf32>
    %2 = tpu.matmul %0, %1, %cst {dimension_numbers = #tpu.dot_dimension_numbers<[1], [0], [0], [1], [0, 0, 1, 1], [], []>} : vector<1x128xf32>, vector<128x512xf32>, vector<1x512xf32> -> vector<1x512xf32>
    %c0_3 = arith.constant 0 : index
    %c0_4 = arith.constant 0 : index
    %3 = vector.load %arg3[%c0_3, %c0_4] : memref<1x512xf32, #tpu.memory_space<vmem>>, vector<1x512xf32>
    %4 = arith.addf %2, %3 : vector<1x512xf32>
    %5 = vector.extract_strided_slice %4 {offsets = [0, 0], sizes = [1, 128], strides = [1, 1]} : vector<1x512xf32> to vector<1x128xf32>
    %c0_5 = arith.constant 0 : index
    %c0_6 = arith.constant 0 : index
    %c0_7 = arith.constant 0 : index
    %6 = vector.load %arg4[%c0_5, %c0_6, %c0_7] : memref<4x128x128xf32, #tpu.memory_space<vmem>>, vector<1x128x128xf32>
    %7 = vector.shape_cast %6 : vector<1x128x128xf32> to vector<128x128xf32>
    %cst_8 = arith.constant dense<0.000000e+00> : vector<1x128xf32>
    %8 = tpu.matmul %0, %7, %cst_8 {dimension_numbers = #tpu.dot_dimension_numbers<[1], [0], [0], [1], [0, 0, 1, 1], [], []>} : vector<1x128xf32>, vector<128x128xf32>, vector<1x128xf32> -> vector<1x128xf32>
    %9 = arith.addf %5, %8 : vector<1x128xf32>
    %10 = math.tanh %9 : vector<1x128xf32>
    %c0_9 = arith.constant 0 : index
    %c0_10 = arith.constant 0 : index
    %c0_11 = arith.constant 0 : index
    %11 = vector.load %arg5[%c0_9, %c0_10, %c0_11] : memref<4x128x128xf32, #tpu.memory_space<vmem>>, vector<1x128x128xf32>
    %12 = vector.shape_cast %11 : vector<1x128x128xf32> to vector<128x128xf32>
    %cst_12 = arith.constant dense<0.000000e+00> : vector<1x128xf32>
    %13 = tpu.matmul %10, %12, %cst_12 {dimension_numbers = #tpu.dot_dimension_numbers<[1], [0], [0], [1], [0, 0, 1, 1], [], []>} : vector<1x128xf32>, vector<128x128xf32>, vector<1x128xf32> -> vector<1x128xf32>
    %14 = arith.addf %0, %13 : vector<1x128xf32>
    %15 = vector.extract_strided_slice %4 {offsets = [0, 128], sizes = [1, 128], strides = [1, 1]} : vector<1x512xf32> to vector<1x128xf32>
    %c1 = arith.constant 1 : index
    %c0_13 = arith.constant 0 : index
    %c0_14 = arith.constant 0 : index
    %16 = vector.load %arg4[%c1, %c0_13, %c0_14] : memref<4x128x128xf32, #tpu.memory_space<vmem>>, vector<1x128x128xf32>
    %17 = vector.shape_cast %16 : vector<1x128x128xf32> to vector<128x128xf32>
    %cst_15 = arith.constant dense<0.000000e+00> : vector<1x128xf32>
    %18 = tpu.matmul %14, %17, %cst_15 {dimension_numbers = #tpu.dot_dimension_numbers<[1], [0], [0], [1], [0, 0, 1, 1], [], []>} : vector<1x128xf32>, vector<128x128xf32>, vector<1x128xf32> -> vector<1x128xf32>
    %19 = arith.addf %15, %18 : vector<1x128xf32>
    %20 = math.tanh %19 : vector<1x128xf32>
    %c1_16 = arith.constant 1 : index
    %c0_17 = arith.constant 0 : index
    %c0_18 = arith.constant 0 : index
    %21 = vector.load %arg5[%c1_16, %c0_17, %c0_18] : memref<4x128x128xf32, #tpu.memory_space<vmem>>, vector<1x128x128xf32>
    %22 = vector.shape_cast %21 : vector<1x128x128xf32> to vector<128x128xf32>
    %cst_19 = arith.constant dense<0.000000e+00> : vector<1x128xf32>
    %23 = tpu.matmul %20, %22, %cst_19 {dimension_numbers = #tpu.dot_dimension_numbers<[1], [0], [0], [1], [0, 0, 1, 1], [], []>} : vector<1x128xf32>, vector<128x128xf32>, vector<1x128xf32> -> vector<1x128xf32>
    %24 = arith.addf %14, %23 : vector<1x128xf32>
    %25 = vector.extract_strided_slice %4 {offsets = [0, 256], sizes = [1, 128], strides = [1, 1]} : vector<1x512xf32> to vector<1x128xf32>
    %c2 = arith.constant 2 : index
    %c0_20 = arith.constant 0 : index
    %c0_21 = arith.constant 0 : index
    %26 = vector.load %arg4[%c2, %c0_20, %c0_21] : memref<4x128x128xf32, #tpu.memory_space<vmem>>, vector<1x128x128xf32>
    %27 = vector.shape_cast %26 : vector<1x128x128xf32> to vector<128x128xf32>
    %cst_22 = arith.constant dense<0.000000e+00> : vector<1x128xf32>
    %28 = tpu.matmul %24, %27, %cst_22 {dimension_numbers = #tpu.dot_dimension_numbers<[1], [0], [0], [1], [0, 0, 1, 1], [], []>} : vector<1x128xf32>, vector<128x128xf32>, vector<1x128xf32> -> vector<1x128xf32>
    %29 = arith.addf %25, %28 : vector<1x128xf32>
    %30 = math.tanh %29 : vector<1x128xf32>
    %c2_23 = arith.constant 2 : index
    %c0_24 = arith.constant 0 : index
    %c0_25 = arith.constant 0 : index
    %31 = vector.load %arg5[%c2_23, %c0_24, %c0_25] : memref<4x128x128xf32, #tpu.memory_space<vmem>>, vector<1x128x128xf32>
    %32 = vector.shape_cast %31 : vector<1x128x128xf32> to vector<128x128xf32>
    %cst_26 = arith.constant dense<0.000000e+00> : vector<1x128xf32>
    %33 = tpu.matmul %30, %32, %cst_26 {dimension_numbers = #tpu.dot_dimension_numbers<[1], [0], [0], [1], [0, 0, 1, 1], [], []>} : vector<1x128xf32>, vector<128x128xf32>, vector<1x128xf32> -> vector<1x128xf32>
    %34 = arith.addf %24, %33 : vector<1x128xf32>
    %35 = vector.extract_strided_slice %4 {offsets = [0, 384], sizes = [1, 128], strides = [1, 1]} : vector<1x512xf32> to vector<1x128xf32>
    %c3 = arith.constant 3 : index
    %c0_27 = arith.constant 0 : index
    %c0_28 = arith.constant 0 : index
    %36 = vector.load %arg4[%c3, %c0_27, %c0_28] : memref<4x128x128xf32, #tpu.memory_space<vmem>>, vector<1x128x128xf32>
    %37 = vector.shape_cast %36 : vector<1x128x128xf32> to vector<128x128xf32>
    %cst_29 = arith.constant dense<0.000000e+00> : vector<1x128xf32>
    %38 = tpu.matmul %34, %37, %cst_29 {dimension_numbers = #tpu.dot_dimension_numbers<[1], [0], [0], [1], [0, 0, 1, 1], [], []>} : vector<1x128xf32>, vector<128x128xf32>, vector<1x128xf32> -> vector<1x128xf32>
    %39 = arith.addf %35, %38 : vector<1x128xf32>
    %40 = math.tanh %39 : vector<1x128xf32>
    %c3_30 = arith.constant 3 : index
    %c0_31 = arith.constant 0 : index
    %c0_32 = arith.constant 0 : index
    %41 = vector.load %arg5[%c3_30, %c0_31, %c0_32] : memref<4x128x128xf32, #tpu.memory_space<vmem>>, vector<1x128x128xf32>
    %42 = vector.shape_cast %41 : vector<1x128x128xf32> to vector<128x128xf32>
    %cst_33 = arith.constant dense<0.000000e+00> : vector<1x128xf32>
    %43 = tpu.matmul %40, %42, %cst_33 {dimension_numbers = #tpu.dot_dimension_numbers<[1], [0], [0], [1], [0, 0, 1, 1], [], []>} : vector<1x128xf32>, vector<128x128xf32>, vector<1x128xf32> -> vector<1x128xf32>
    %44 = arith.addf %34, %43 : vector<1x128xf32>
    %c0_34 = arith.constant 0 : index
    %c0_35 = arith.constant 0 : index
    %45 = vector.load %arg6[%c0_34, %c0_35] : memref<1x128xf32, #tpu.memory_space<vmem>>, vector<1x128xf32>
    tpu.vector_store %arg6[%c0_34, %c0_35], %44 {strides = array<i32>} : memref<1x128xf32, #tpu.memory_space<vmem>>, vector<1x128xf32>,
    return
  }
  func.func @transform_0(%arg0: i32) -> (i32, i32) {
    %c0_i32 = arith.constant 0 : i32
    %c0_i32_0 = arith.constant 0 : i32
    %c0_i32_1 = arith.constant 0 : i32
    return %c0_i32, %c0_i32_0 : i32, i32
  }
  func.func @transform_1(%arg0: i32) -> (i32, i32) {
    %c0_i32 = arith.constant 0 : i32
    %c0_i32_0 = arith.constant 0 : i32
    %c0_i32_1 = arith.constant 0 : i32
    return %c0_i32, %c0_i32_0 : i32, i32
  }
  func.func @transform_2(%arg0: i32) -> (i32, i32) {
    %c0_i32 = arith.constant 0 : i32
    %c0_i32_0 = arith.constant 0 : i32
    %c0_i32_1 = arith.constant 0 : i32
    return %c0_i32, %c0_i32_0 : i32, i32
  }
  func.func @transform_3(%arg0: i32) -> (i32, i32, i32) {
    %c0_i32 = arith.constant 0 : i32
    %c0_i32_0 = arith.constant 0 : i32
    %c0_i32_1 = arith.constant 0 : i32
    %c0_i32_2 = arith.constant 0 : i32
    return %c0_i32, %c0_i32_0, %c0_i32_1 : i32, i32, i32
  }
  func.func @transform_4(%arg0: i32) -> (i32, i32, i32) {
    %c0_i32 = arith.constant 0 : i32
    %c0_i32_0 = arith.constant 0 : i32
    %c0_i32_1 = arith.constant 0 : i32
    %c0_i32_2 = arith.constant 0 : i32
    return %c0_i32, %c0_i32_0, %c0_i32_1 : i32, i32, i32
  }
  func.func @transform_5(%arg0: i32) -> (i32, i32) {
    %c0_i32 = arith.constant 0 : i32
    %c0_i32_0 = arith.constant 0 : i32
    %c0_i32_1 = arith.constant 0 : i32
    return %c0_i32, %c0_i32_0 : i32, i32
  }
}

</mosaic_0001>

<bundles_post_ra>
// kernel: deepskip_forward.1
= control target key start
LH: loop header
LB: loop body
LE: loop exit
PB: predicated region body
PF: predicated region fallthrough
CT: control target
= control target key end

     0   :  { %10 = vsyncpa [#allocation3], 0  ;;  %s1971_s0 = inlined_call_operand.vmem [shape: f32[1,128], index: 0, kind: input, shape index: {}]   ;;  %s1972_s1 = inlined_call_operand.hbm [shape: f32[128,512], index: 1, kind: input, shape index: {}]   ;;  %s1973_s2 = inlined_call_operand.vmem [shape: f32[1,512], index: 2, kind: input, shape index: {}]   ;;  %s1974_s3 = inlined_call_operand.hbm [shape: f32[4,128,128], index: 3, kind: input, shape index: {}]   ;;  %s1975_s4 = inlined_call_operand.hbm [shape: f32[4,128,128], index: 4, kind: input, shape index: {}]   ;;  %s1976_s5 = inlined_call_operand.vmem [shape: f32[1,128], index: 5, kind: output, shape index: {}]  }
   0x1   :  { %11 = vsyncpa [#allocation5], 0  ;;  %s1763_s18 = smov [#allocation4]   ;;  %s1693_s22 = scalar_lea.hbm %s1974_s3, 8192 }
   0x2   :  { %s33_s19 = sshll.u32 %s1763_s18, 4  ;;  %p1694_p0 = scmp.ne.s32.totalorder %s1974_s3, %s1693_s22  ;;  %s34_s19 = int_to_ptr.vmem [resolvable:$true] %s33_s19 }
   0x3   :  { %p1697_p1 = scmp.lt.u32.totalorder %s1693_s22, %s1974_s3 }
   0x5   :  { %p1699_p2 = pnand %p1697_p1, %p1694_p0 }
   0x7   :  { %1702 = shalt.err (!%p1699_p2)
}
   0x8   :  { %s1703_s27 = scalar_lea.vmem %s34_s19, 8192  ;;  %p1708_p4 = scmp.lt.s32.totalorder %s34_s19, %s34_s19 }
   0x9   :  { %p1704_p3 = scmp.ne.s32.totalorder %s34_s19, %s1703_s27  ;;  %p1709_p5 = scmp.lt.s32.totalorder %s1703_s27, %s1703_s27 }
   0xb   :  { %p1710_p6 = por %p1709_p5, %p1708_p4 }
   0xd   :  { %p1711_p7 = pnand %p1710_p6, %p1704_p3 }
   0xf   :  { %1714 = shalt.err (!%p1711_p7)
}
  0x10   :  { %s1764_s28 = smov 128   ;;  %s1765_s29 = smov 8  }
  0x11   :  { %39 = dma.hbm_to_vmem [thread:$0]  %s1974_s3, 8192, %s34_s19, [#allocation5], %s1764_s28, %s1764_s28, %s1765_s29  }
  0x12   :  { %s1766_s7 = smov [#allocation2]   ;;  %s1715_s11 = scalar_lea.hbm %s1972_s1, 8192 }
  0x13   :  { %s19_s8 = sshll.u32 %s1766_s7, 4  ;;  %p1716_p8 = scmp.ne.s32.totalorder %s1972_s1, %s1715_s11  ;;  %s20_s8 = int_to_ptr.vmem [resolvable:$true] %s19_s8 }
  0x14   :  { %p1719_p9 = scmp.lt.u32.totalorder %s1715_s11, %s1972_s1 }
  0x16   :  { %p1721_p10 = pnand %p1719_p9, %p1716_p8 }
  0x18   :  { %1724 = shalt.err (!%p1721_p10)
}
  0x19   :  { %s1725_s16 = scalar_lea.vmem %s20_s8, 8192  ;;  %p1730_p12 = scmp.lt.s32.totalorder %s20_s8, %s20_s8 }
  0x1a   :  { %p1726_p11 = scmp.ne.s32.totalorder %s20_s8, %s1725_s16  ;;  %p1731_p13 = scmp.lt.s32.totalorder %s1725_s16, %s1725_s16 }
  0x1c   :  { %p1732_p0 = por %p1731_p13, %p1730_p12 }
  0x1e   :  { %p1733_p1 = pnand %p1732_p0, %p1726_p11 }
  0x20   :  { %1736 = shalt.err (!%p1733_p1)
}
  0x21   :  { %s1767_s3 = smov 512   ;;  %s1768_s17 = smov 32  }
  0x22   :  { %25 = dma.hbm_to_vmem [thread:$0]  %s1972_s1, 8192, %s20_s8, [#allocation3], %s1767_s3, %s1767_s3, %s1768_s17  }
  0x23   :  { %s1769_s20 = smov [#allocation6]   ;;  %s1737_s24 = scalar_lea.hbm %s1975_s4, 8192 }
  0x24   :  { %s45_s21 = sshll.u32 %s1769_s20, 4  ;;  %p1738_p2 = scmp.ne.s32.totalorder %s1975_s4, %s1737_s24  ;;  %s46_s21 = int_to_ptr.vmem [resolvable:$true] %s45_s21 }
  0x25   :  { %p1741_p3 = scmp.lt.u32.totalorder %s1737_s24, %s1975_s4 }
  0x27   :  { %p1743_p4 = pnand %p1741_p3, %p1738_p2 }
  0x29   :  { %1746 = shalt.err (!%p1743_p4)
}
  0x2a   :  { %s1747_s6 = scalar_lea.vmem %s46_s21, 8192  ;;  %p1752_p6 = scmp.lt.s32.totalorder %s46_s21, %s46_s21 }
  0x2b   :  { %p1748_p5 = scmp.ne.s32.totalorder %s46_s21, %s1747_s6  ;;  %p1753_p7 = scmp.lt.s32.totalorder %s1747_s6, %s1747_s6 }
  0x2d   :  { %p1754_p8 = por %p1753_p7, %p1752_p6 }
  0x2f   :  { %p1755_p9 = pnand %p1754_p8, %p1748_p5 }
  0x31   :  { %1758 = shalt.err (!%p1755_p9)
}
  0x32   :  { %51 = dma.hbm_to_vmem [thread:$0]  %s1975_s4, 8192, %s46_s21, [#allocation5], %s1764_s28, %s1764_s28, %s1765_s29  }
  0x33   :  { %1759 = dma.done.wait [#allocation3], 8192  }
  0x34   :  { %1760 = vsyncadd [#allocation3], 4294959104 }
  0x35   :  { %1761 = dma.done.wait [#allocation5], 16384  }
  0x36   :  { %1762 = vsyncadd [#allocation5], 4294950912  ;;  %v1770_v0 = vmov 0.0   ;;  %v63_v1 = vld [vmem:[#allocation2 + $0x8] sm:$0xff]  ;;  %v62_v3 = vld [vmem:[#allocation2] sm:$0xff]  ;;  %vm1772_vm0 = vmmov 0  }
  0x37   :  { %212 = vmatprep.mubr.f32.mxu0 %v1770_v0  ;;  %283 = vmatprep.mubr.f32.mxu1 %v1770_v0  ;;  %v67_v2 = vld [vmem:[#allocation2 + $0x28] sm:$0xff]  ;;  %v66_v5 = vld [vmem:[#allocation2 + $0x20] sm:$0xff]  ;;  %v65_v37 = vld [vmem:[#allocation2 + $0x18] sm:$0xff] }
  0x38   :  { %v1419_v4 = vpack.c.bf16 %v67_v2, %v63_v1  ;;  %v71_v6 = vld [vmem:[#allocation2 + $0x48] sm:$0xff]  ;;  %v1421_v8 = vpack.c.bf16 %v66_v5, %v62_v3  ;;  %v70_v10 = vld [vmem:[#allocation2 + $0x40] sm:$0xff]  ;;  %v69_v38 = vld [vmem:[#allocation2 + $0x38] sm:$0xff] }
  0x39   :  { %v75_v7 = vld [vmem:[#allocation2 + $0x68] sm:$0xff]  ;;  %v74_v11 = vld [vmem:[#allocation2 + $0x60] sm:$0xff]  ;;  %v1451_v40 = vpack.c.bf16 %v69_v38, %v65_v37  ;;  %v64_v41 = vld [vmem:[#allocation2 + $0x10] sm:$0xff] }
  0x3a   :  { %v1423_v9 = vpack.c.bf16 %v75_v7, %v71_v6  ;;  %v79_v12 = vld [vmem:[#allocation2 + $0x88] sm:$0xff]  ;;  %1420 = vmatprep.subr.bf16.mxu0 %v1419_v4  ;;  %v1425_v14 = vpack.c.bf16 %v74_v11, %v70_v10  ;;  %v78_v16 = vld [vmem:[#allocation2 + $0x80] sm:$0xff]  ;;  %v68_v42 = vld [vmem:[#allocation2 + $0x30] sm:$0xff] }
  0x3b   :  { %v83_v13 = vld [vmem:[#allocation2 + $0xa8] sm:$0xff]  ;;  %1422 = vmatpush1.bf16.msra.mxu0 %v1421_v8  ;;  %v82_v17 = vld [vmem:[#allocation2 + $0xa0] sm:$0xff]  ;;  %v73_v43 = vld [vmem:[#allocation2 + $0x58] sm:$0xff]  ;;  %v1453_v44 = vpack.c.bf16 %v68_v42, %v64_v41  ;;  %1452 = vmatprep.subr.bf16.mxu1 %v1451_v40 }
  0x3c   :  { %1424 = vmatprep.subr.bf16.mxu0 %v1423_v9  ;;  %v1427_v15 = vpack.c.bf16 %v83_v13, %v79_v12  ;;  %v87_v18 = vld [vmem:[#allocation2 + $0xc8] sm:$0xff]  ;;  %v1429_v20 = vpack.c.bf16 %v82_v17, %v78_v16  ;;  %v86_v22 = vld [vmem:[#allocation2 + $0xc0] sm:$0xff]  ;;  %v77_v45 = vld [vmem:[#allocation2 + $0x78] sm:$0xff] }
  0x3d   :  { %v91_v19 = vld [vmem:[#allocation2 + $0xe8] sm:$0xff]  ;;  %v90_v23 = vld [vmem:[#allocation2 + $0xe0] sm:$0xff]  ;;  %v72_v46 = vld [vmem:[#allocation2 + $0x50] sm:$0xff]  ;;  %v1455_v48 = vpack.c.bf16 %v77_v45, %v73_v43  ;;  %1454 = vmatpush1.bf16.msra.mxu1 %v1453_v44 }
  0x3e   :  { %v1431_v21 = vpack.c.bf16 %v91_v19, %v87_v18  ;;  %v95_v24 = vld [vmem:[#allocation2 + $0x108] sm:$0xff]  ;;  %v1433_v26 = vpack.c.bf16 %v90_v23, %v86_v22  ;;  %v94_v28 = vld [vmem:[#allocation2 + $0x100] sm:$0xff]  ;;  %v76_v47 = vld [vmem:[#allocation2 + $0x70] sm:$0xff]  ;;  %v1771_v19 = vmov 0.0|0.0  }
  0x3f   :  { %1426 = vmatpush1.bf16.msra.mxu0 %v1425_v14  ;;  %v99_v25 = vld [vmem:[#allocation2 + $0x128] sm:$0xff]  ;;  %v98_v29 = vld [vmem:[#allocation2 + $0x120] sm:$0xff]  ;;  %v81_v49 = vld [vmem:[#allocation2 + $0x98] sm:$0xff]  ;;  %v1457_v54 = vpack.c.bf16 %v76_v47, %v72_v46  ;;  %1456 = vmatprep.subr.bf16.mxu1 %v1455_v48 }
  0x40   :  { %1428 = vmatprep.subr.bf16.mxu0 %v1427_v15  ;;  %v1435_v27 = vpack.c.bf16 %v99_v25, %v95_v24  ;;  %v103_v30 = vld [vmem:[#allocation2 + $0x148] sm:$0xff]  ;;  %v102_v32 = vld [vmem:[#allocation2 + $0x140] sm:$0xff]  ;;  %v1437_v34 = vpack.c.bf16 %v98_v29, %v94_v28  ;;  %v85_v50 = vld [vmem:[#allocation2 + $0xb8] sm:$0xff] }
  0x41   :  { %v107_v31 = vld [vmem:[#allocation2 + $0x168] sm:$0xff]  ;;  %v106_v33 = vld [vmem:[#allocation2 + $0x160] sm:$0xff]  ;;  %v1459_v57 = vpack.c.bf16 %v85_v50, %v81_v49  ;;  %v80_v58 = vld [vmem:[#allocation2 + $0x90] sm:$0xff]  ;;  %1458 = vmatpush1.bf16.msra.mxu1 %v1457_v54 }
  0x42   :  { %v111_v35 = vld [vmem:[#allocation2 + $0x188] sm:$0xff]  ;;  %v1439_v39 = vpack.c.bf16 %v107_v31, %v103_v30  ;;  %v1441_v51 = vpack.c.bf16 %v106_v33, %v102_v32  ;;  %v110_v52 = vld [vmem:[#allocation2 + $0x180] sm:$0xff]  ;;  %v84_v59 = vld [vmem:[#allocation2 + $0xb0] sm:$0xff] }
  0x43   :  { %1430 = vmatpush1.bf16.msra.mxu0 %v1429_v20  ;;  %v115_v36 = vld [vmem:[#allocation2 + $0x1a8] sm:$0xff]  ;;  %v114_v53 = vld [vmem:[#allocation2 + $0x1a0] sm:$0xff]  ;;  %v89_v61 = vld [vmem:[#allocation2 + $0xd8] sm:$0xff]  ;;  %v1461_v2 = vpack.c.bf16 %v84_v59, %v80_v58  ;;  %1460 = vmatprep.subr.bf16.mxu1 %v1459_v57 }
  0x44   :  { %1432 = vmatprep.subr.bf16.mxu0 %v1431_v21  ;;  %v1443_v55 = vpack.c.bf16 %v115_v36, %v111_v35  ;;  %v119_v56 = vld [vmem:[#allocation2 + $0x1c8] sm:$0xff]  ;;  %v93_v62 = vld [vmem:[#allocation2 + $0xf8] sm:$0xff]  ;;  %v1445_v63 = vpack.c.bf16 %v114_v53, %v110_v52  ;;  %v118_v1 = vld [vmem:[#allocation2 + $0x1c0] sm:$0xff] }
  0x45   :  { %v123_v60 = vld [vmem:[#allocation2 + $0x1e8] sm:$0xff]  ;;  %v122_v4 = vld [vmem:[#allocation2 + $0x1e0] sm:$0xff]  ;;  %v1463_v5 = vpack.c.bf16 %v93_v62, %v89_v61  ;;  %v88_v6 = vld [vmem:[#allocation2 + $0xd0] sm:$0xff]  ;;  %1462 = vmatpush1.bf16.msra.mxu1 %v1461_v2 }
  0x46   :  { %v1447_v3 = vpack.c.bf16 %v123_v60, %v119_v56  ;;  %v92_v7 = vld [vmem:[#allocation2 + $0xf0] sm:$0xff]  ;;  %v97_v8 = vld [vmem:[#allocation2 + $0x118] sm:$0xff]  ;;  %v1449_v10 = vpack.c.bf16 %v122_v4, %v118_v1  ;;  %v290_v12 = vld [vmem:[#allocation4] sm:$0xff] }
  0x47   :  { %1434 = vmatpush1.bf16.msra.mxu0 %v1433_v26  ;;  %v101_v9 = vld [vmem:[#allocation2 + $0x138] sm:$0xff]  ;;  %v1465_v11 = vpack.c.bf16 %v92_v7, %v88_v6  ;;  %v291_v13 = vld [vmem:[#allocation4 + $0x8] sm:$0xff]  ;;  %1464 = vmatprep.subr.bf16.mxu1 %v1463_v5  ;;  %v96_v15 = vld [vmem:[#allocation2 + $0x110] sm:$0xff] }
  0x48   :  { %1436 = vmatprep.subr.bf16.mxu0 %v1435_v27  ;;  %v1467_v14 = vpack.c.bf16 %v101_v9, %v97_v8  ;;  %v100_v16 = vld [vmem:[#allocation2 + $0x130] sm:$0xff]  ;;  %v1850_v17 = vld [vmem:[%s1971_s0] sm:$0x1]  ;;  %v1484_v18 = vpack.c.bf16 %v291_v13, %v290_v12  ;;  %v293_v21 = vld [vmem:[#allocation4 + $0x18] sm:$0xff] }
  0x49   :  { %1466 = vmatpush1.bf16.msra.mxu1 %v1465_v11  ;;  %v292_v20 = vld [vmem:[#allocation4 + $0x10] sm:$0xff]  ;;  %v1469_v22 = vpack.c.bf16 %v100_v16, %v96_v15  ;;  %v294_v24 = vld [vmem:[#allocation4 + $0x20] sm:$0xff]  ;;  %v295_v25 = vld [vmem:[#allocation4 + $0x28] sm:$0xff] }
  0x4a   :  { %1468 = vmatprep.subr.bf16.mxu1 %v1467_v14  ;;  %v1487_v23 = vpack.c.bf16 %v293_v21, %v292_v20  ;;  %v1490_v26 = vpack.c.bf16 %v295_v25, %v294_v24  ;;  %v296_v27 = vld [vmem:[#allocation4 + $0x30] sm:$0xff]  ;;  %v297_v28 = vld [vmem:[#allocation4 + $0x38] sm:$0xff]  ;;  %v298_v30 = vld [vmem:[#allocation4 + $0x40] sm:$0xff] }
  0x4b   :  { %1438 = vmatpush1.bf16.msra.mxu0 %v1437_v34  ;;  %v1493_v29 = vpack.c.bf16 %v297_v28, %v296_v27  ;;  %v299_v31 = vld [vmem:[#allocation4 + $0x48] sm:$0xff]  ;;  %v300_v33 = vld [vmem:[#allocation4 + $0x50] sm:$0xff]  ;;  %v301_v34 = vld [vmem:[#allocation4 + $0x58] sm:$0xff] }
  0x4c   :  { %1440 = vmatprep.subr.bf16.mxu0 %v1439_v39  ;;  %v1496_v32 = vpack.c.bf16 %v299_v31, %v298_v30  ;;  %v1499_v35 = vpack.c.bf16 %v301_v34, %v300_v33  ;;  %v302_v36 = vld [vmem:[#allocation4 + $0x60] sm:$0xff]  ;;  %v303_v37 = vld [vmem:[#allocation4 + $0x68] sm:$0xff]  ;;  %v304_v39 = vld [vmem:[#allocation4 + $0x70] sm:$0xff] }
  0x4d   :  { %1470 = vmatpush1.bf16.msra.mxu1 %v1469_v22  ;;  %v1502_v38 = vpack.c.bf16 %v303_v37, %v302_v36  ;;  %v305_v40 = vld [vmem:[#allocation4 + $0x78] sm:$0xff]  ;;  %v104_v45 = vld [vmem:[#allocation2 + $0x150] sm:$0xff]  ;;  %v378_v60 = vld [vmem:[#allocation6] sm:$0xff] }
  0x4e   :  { %v1505_v41 = vpack.c.bf16 %v305_v40, %v304_v39  ;;  %v105_v42 = vld [vmem:[#allocation2 + $0x158] sm:$0xff]  ;;  %v108_v46 = vld [vmem:[#allocation2 + $0x170] sm:$0xff]  ;;  %v379_v61 = vld [vmem:[#allocation6 + $0x8] sm:$0xff] }
  0x4f   :  { %1442 = vmatpush1.bf16.msra.mxu0 %v1441_v51  ;;  %v109_v43 = vld [vmem:[#allocation2 + $0x178] sm:$0xff]  ;;  %v1473_v47 = vpack.c.bf16 %v108_v46, %v104_v45  ;;  %v112_v50 = vld [vmem:[#allocation2 + $0x190] sm:$0xff]  ;;  %v1508_v62 = vpack.c.bf16 %v379_v61, %v378_v60  ;;  %v383_v4 = vld [vmem:[#allocation6 + $0x28] sm:$0xff]  ;;  %v128_v46 = vlaneseq }
  0x50   :  { %1444 = vmatprep.subr.bf16.mxu0 %v1443_v55  ;;  %v1471_v44 = vpack.c.bf16 %v109_v43, %v105_v42  ;;  %v113_v48 = vld [vmem:[#allocation2 + $0x198] sm:$0xff]  ;;  %v116_v52 = vld [vmem:[#allocation2 + $0x1b0] sm:$0xff]  ;;  %v386_v9 = vld [vmem:[#allocation6 + $0x40] sm:$0xff] }
  0x51   :  { %v117_v49 = vld [vmem:[#allocation2 + $0x1b8] sm:$0xff]  ;;  %v1477_v55 = vpack.c.bf16 %v116_v52, %v112_v50  ;;  %v120_v57 = vld [vmem:[#allocation2 + $0x1d0] sm:$0xff]  ;;  %v390_v15 = vld [vmem:[#allocation6 + $0x60] sm:$0xff] }
  0x52   :  { %1472 = vmatprep.subr.bf16.mxu1 %v1471_v44  ;;  %v1475_v51 = vpack.c.bf16 %v117_v49, %v113_v48  ;;  %v121_v53 = vld [vmem:[#allocation2 + $0x1d8] sm:$0xff]  ;;  %v124_v58 = vld [vmem:[#allocation2 + $0x1f0] sm:$0xff]  ;;  %v391_v16 = vld [vmem:[#allocation6 + $0x68] sm:$0xff] }
  0x53   :  { %1446 = vmatpush1.bf16.msra.mxu0 %v1445_v63  ;;  %1474 = vmatpush1.bf16.msra.mxu1 %v1473_v47  ;;  %v125_v54 = vld [vmem:[#allocation2 + $0x1f8] sm:$0xff]  ;;  %v1481_v59 = vpack.c.bf16 %v124_v58, %v120_v57  ;;  %v380_v63 = vld [vmem:[#allocation6 + $0x10] sm:$0xff]  ;;  %v467_v24 = vld [vmem:[#allocation4 + $0x88] sm:$0xff]  ;;  %v1888_v47 = vshrl.u32 %v128_v46, 7 }
  0x54   :  { %1448 = vmatprep.subr.bf16.mxu0 %v1447_v3  ;;  %v1479_v56 = vpack.c.bf16 %v125_v54, %v121_v53  ;;  %1476 = vmatprep.subr.bf16.mxu1 %v1475_v51  ;;  %v381_v1 = vld [vmem:[#allocation6 + $0x18] sm:$0xff]  ;;  %v382_v3 = vld [vmem:[#allocation6 + $0x20] sm:$0xff]  ;;  %v384_v6 = vld [vmem:[#allocation6 + $0x30] sm:$0xff] }
  0x55   :  { %v1511_v2 = vpack.c.bf16 %v381_v1, %v380_v63  ;;  %v1514_v5 = vpack.c.bf16 %v383_v4, %v382_v3  ;;  %v385_v7 = vld [vmem:[#allocation6 + $0x38] sm:$0xff]  ;;  %v388_v12 = vld [vmem:[#allocation6 + $0x50] sm:$0xff]  ;;  %v471_v30 = vld [vmem:[#allocation4 + $0xa8] sm:$0xff]  ;;  %v130_v48 = vsub.s32 0, %v1888_v47 }
  0x56   :  { %v1517_v8 = vpack.c.bf16 %v385_v7, %v384_v6  ;;  %v389_v13 = vld [vmem:[#allocation6 + $0x58] sm:$0xff]  ;;  %v392_v20 = vld [vmem:[#allocation6 + $0x70] sm:$0xff]  ;;  %v475_v36 = vld [vmem:[#allocation4 + $0xc8] sm:$0xff] }
  0x57   :  { %1450 = vmatpush1.bf16.msra.mxu0 %v1449_v10  ;;  %1478 = vmatpush1.bf16.msra.mxu1 %v1477_v55  ;;  %v387_v10 = vld [vmem:[#allocation6 + $0x48] sm:$0xff]  ;;  %v1523_v14 = vpack.c.bf16 %v389_v13, %v388_v12  ;;  %v393_v21 = vld [vmem:[#allocation6 + $0x78] sm:$0xff]  ;;  %v468_v25 = vld [vmem:[#allocation4 + $0x90] sm:$0xff] }
  0x58   :  { %1483 = vmatprep.subr.bf16.mxu0 %v1771_v19  ;;  %1480 = vmatprep.subr.bf16.mxu1 %v1479_v56  ;;  %v1520_v11 = vpack.c.bf16 %v387_v10, %v386_v9  ;;  %v1529_v22 = vpack.c.bf16 %v393_v21, %v392_v20  ;;  %v469_v27 = vld [vmem:[#allocation4 + $0x98] sm:$0xff]  ;;  %v479_v42 = vld [vmem:[#allocation4 + $0xe8] sm:$0xff]  ;;  %v1894_v49 = vld [vmem:[%s1973_s2] sm:$0xf] }
  0x59   :  { %v1535_v28 = vpack.c.bf16 %v469_v27, %v468_v25  ;;  %v473_v33 = vld [vmem:[#allocation4 + $0xb8] sm:$0xff]  ;;  %v131_v50 = vrot.slane %v1894_v49, %v130_v48  ;;  %v480_v58 = vld [vmem:[#allocation4 + $0xf0] sm:$0xff]  ;;  %v555_v61 = vld [vmem:[#allocation6 + $0x80] sm:$0xff] }
  0x5a   :  { %213 = vmatmul.mubr.f32.vlgmr.msra.gmra.mrb[0].mxu0 %v1850_v17  ;;  %v477_v39 = vld [vmem:[#allocation4 + $0xd8] sm:$0xff]  ;;  %v557_v63 = vld [vmem:[#allocation6 + $0x90] sm:$0xff]  ;;  %v559_v4 = vld [vmem:[#allocation6 + $0xa0] sm:$0xff] }
  0x5b   :  { %1485 = vmatpush3.bf16.msra.mxu0 %v1484_v18  ;;  %1171 = vmatprep.mubr.msk.f32.mxu0 %vm1772_vm0, %v1770_v0  ;;  %v1526_v18 = vpack.c.bf16 %v391_v16, %v390_v15  ;;  %v561_v7 = vld [vmem:[#allocation6 + $0xb0] sm:$0xff]  ;;  %v563_v10 = vld [vmem:[#allocation6 + $0xc0] sm:$0xff]  ;;  %v570_v25 = vld [vmem:[#allocation6 + $0xf8] sm:$0xff] }
  0x5c   :  { %1486 = vmatprep.subr.bf16.mxu0 %v1771_v19  ;;  %1482 = vmatpush1.bf16.msra.mxu1 %v1481_v59  ;;  %v481_v59 = vld [vmem:[#allocation4 + $0xf8] sm:$0xff]  ;;  %v565_v16 = vld [vmem:[#allocation6 + $0xd0] sm:$0xff]  ;;  %v567_v21 = vld [vmem:[#allocation6 + $0xe0] sm:$0xff] }
  0x5d   :  { %1507 = vmatprep.subr.bf16.mxu1 %v1771_v19  ;;  %v1553_v60 = vpack.c.bf16 %v481_v59, %v480_v58  ;;  %v644_v27 = vld [vmem:[#allocation4 + $0x108] sm:$0xff]  ;;  %v657_v59 = vld [vmem:[#allocation4 + $0x170] sm:$0xff] }
  0x5e   :  { %v656_v46 = vld [vmem:[#allocation4 + $0x168] sm:$0xff] }
  0x5f   :  { %1488 = vmatpush3.bf16.msra.mxu0 %v1487_v23  ;;  %284 = vmatmul.mubr.f32.vlgmr.msra.gmra.mrb[0].mxu1 %v1850_v17  ;;  %v466_v23 = vld [vmem:[#allocation4 + $0x80] sm:$0xff] }
  0x60   :  { %1489 = vmatprep.subr.bf16.mxu0 %v1771_v19  ;;  %1509 = vmatpush3.bf16.msra.mxu1 %v1508_v62  ;;  %v556_v62 = vld [vmem:[#allocation6 + $0x88] sm:$0xff] }
  0x61   :  { %1206 = vmatprep.mubr.msk.f32.mxu1 %vm1772_vm0, %v1770_v0  ;;  %1510 = vmatprep.subr.bf16.mxu1 %v1771_v19  ;;  %v1556_v1 = vpack.c.bf16 %v556_v62, %v555_v61  ;;  %v732_v62 = vld [vmem:[#allocation6 + $0x100] sm:$0xff] }
  0x63   :  { %1491 = vmatpush3.bf16.msra.mxu0 %v1490_v26  ;;  %v1532_v26 = vpack.c.bf16 %v467_v24, %v466_v23  ;;  %v569_v24 = vld [vmem:[#allocation6 + $0xf0] sm:$0xff] }
  0x64   :  { %1492 = vmatprep.subr.bf16.mxu0 %v1771_v19  ;;  %1512 = vmatpush3.bf16.msra.mxu1 %v1511_v2  ;;  %v558_v2 = vld [vmem:[#allocation6 + $0x98] sm:$0xff] }
  0x65   :  { %1513 = vmatprep.subr.bf16.mxu1 %v1771_v19  ;;  %v1559_v3 = vpack.c.bf16 %v558_v2, %v557_v63  ;;  %v733_v63 = vld [vmem:[#allocation6 + $0x108] sm:$0xff] }
  0x66   :  { %v1604_v2 = vpack.c.bf16 %v733_v63, %v732_v62  ;;  %v909_v62 = vld [vmem:[#allocation6 + $0x180] sm:$0xff]  ;;  %v910_v63 = vld [vmem:[#allocation6 + $0x188] sm:$0xff] }
  0x67   :  { %1494 = vmatpush3.bf16.msra.mxu0 %v1493_v29  ;;  %v470_v29 = vld [vmem:[#allocation4 + $0xa0] sm:$0xff] }
  0x68   :  { %1495 = vmatprep.subr.bf16.mxu0 %v1771_v19  ;;  %1515 = vmatpush3.bf16.msra.mxu1 %v1514_v5  ;;  %v1538_v31 = vpack.c.bf16 %v471_v30, %v470_v29  ;;  %v560_v5 = vld [vmem:[#allocation6 + $0xa8] sm:$0xff]  ;;  %v646_v30 = vld [vmem:[#allocation4 + $0x118] sm:$0xff] }
  0x69   :  { %1516 = vmatprep.subr.bf16.mxu1 %v1771_v19  ;;  %v1562_v6 = vpack.c.bf16 %v560_v5, %v559_v4  ;;  %v736_v4 = vld [vmem:[#allocation6 + $0x120] sm:$0xff]  ;;  %v737_v5 = vld [vmem:[#allocation6 + $0x128] sm:$0xff] }
  0x6b   :  { %1497 = vmatpush3.bf16.msra.mxu0 %v1496_v32  ;;  %v472_v32 = vld [vmem:[#allocation4 + $0xb0] sm:$0xff] }
  0x6c   :  { %1498 = vmatprep.subr.bf16.mxu0 %v1771_v19  ;;  %1518 = vmatpush3.bf16.msra.mxu1 %v1517_v8  ;;  %v1541_v34 = vpack.c.bf16 %v473_v33, %v472_v32  ;;  %v562_v8 = vld [vmem:[#allocation6 + $0xb8] sm:$0xff]  ;;  %v647_v32 = vld [vmem:[#allocation4 + $0x120] sm:$0xff]  ;;  %v648_v33 = vld [vmem:[#allocation4 + $0x128] sm:$0xff] }
  0x6d   :  { %1519 = vmatprep.subr.bf16.mxu1 %v1771_v19  ;;  %v1565_v9 = vpack.c.bf16 %v562_v8, %v561_v7  ;;  %v738_v7 = vld [vmem:[#allocation6 + $0x130] sm:$0xff]  ;;  %v739_v8 = vld [vmem:[#allocation6 + $0x138] sm:$0xff] }
  0x6f   :  { %1500 = vmatpush3.bf16.msra.mxu0 %v1499_v35  ;;  %v474_v35 = vld [vmem:[#allocation4 + $0xc0] sm:$0xff] }
  0x70   :  { %1501 = vmatprep.subr.bf16.mxu0 %v1771_v19  ;;  %1521 = vmatpush3.bf16.msra.mxu1 %v1520_v11  ;;  %v1544_v37 = vpack.c.bf16 %v475_v36, %v474_v35  ;;  %v564_v11 = vld [vmem:[#allocation6 + $0xc8] sm:$0xff]  ;;  %v649_v35 = vld [vmem:[#allocation4 + $0x130] sm:$0xff]  ;;  %v650_v36 = vld [vmem:[#allocation4 + $0x138] sm:$0xff] }
  0x71   :  { %1522 = vmatprep.subr.bf16.mxu1 %v1771_v19  ;;  %v1568_v12 = vpack.c.bf16 %v564_v11, %v563_v10  ;;  %v740_v10 = vld [vmem:[#allocation6 + $0x140] sm:$0xff]  ;;  %v741_v11 = vld [vmem:[#allocation6 + $0x148] sm:$0xff] }
  0x73   :  { %1503 = vmatpush3.bf16.msra.mxu0 %v1502_v38  ;;  %v476_v38 = vld [vmem:[#allocation4 + $0xd0] sm:$0xff] }
  0x74   :  { %1504 = vmatprep.subr.bf16.mxu0 %v1771_v19  ;;  %1524 = vmatpush3.bf16.msra.mxu1 %v1523_v14  ;;  %v1547_v40 = vpack.c.bf16 %v477_v39, %v476_v38  ;;  %v651_v38 = vld [vmem:[#allocation4 + $0x140] sm:$0xff]  ;;  %v652_v39 = vld [vmem:[#allocation4 + $0x148] sm:$0xff] }
  0x75   :  { %1525 = vmatprep.subr.bf16.mxu1 %v1771_v19 }
  0x77   :  { %1506 = vmatpush3.bf16.msra.mxu0 %v1505_v41  ;;  %v478_v41 = vld [vmem:[#allocation4 + $0xe0] sm:$0xff] }
  0x78   :  { %1531 = vmatprep.subr.bf16.mxu0 %v1771_v19  ;;  %1527 = vmatpush3.bf16.msra.mxu1 %v1526_v18  ;;  %v1550_v43 = vpack.c.bf16 %v479_v42, %v478_v41  ;;  %v566_v18 = vld [vmem:[#allocation6 + $0xd8] sm:$0xff]  ;;  %v653_v41 = vld [vmem:[#allocation4 + $0x150] sm:$0xff] }
  0x79   :  { %1528 = vmatprep.subr.bf16.mxu1 %v1771_v19  ;;  %v1571_v20 = vpack.c.bf16 %v566_v18, %v565_v16  ;;  %v654_v42 = vld [vmem:[#allocation4 + $0x158] sm:$0xff]  ;;  %v742_v18 = vld [vmem:[#allocation6 + $0x150] sm:$0xff] }
  0x7a   :  { %1172 = vmatmul.mubr.f32.vlgmr.msra.gmra.mrb[2].mxu0 %v1850_v17 }
  0x7b   :  { %1241 = vmatprep.mubr.msk.f32.mxu0 %vm1772_vm0, %v1770_v0  ;;  %1533 = vmatpush3.bf16.msra.mxu0 %v1532_v26  ;;  %v643_v26 = vld [vmem:[#allocation4 + $0x100] sm:$0xff] }
  0x7c   :  { %1530 = vmatpush3.bf16.msra.mxu1 %v1529_v22  ;;  %1534 = vmatprep.subr.bf16.mxu0 %v1771_v19  ;;  %v568_v22 = vld [vmem:[#allocation6 + $0xe8] sm:$0xff]  ;;  %v1580_v29 = vpack.c.bf16 %v644_v27, %v643_v26  ;;  %v820_v26 = vld [vmem:[#allocation4 + $0x180] sm:$0xff] }
  0x7d   :  { %1555 = vmatprep.subr.bf16.mxu1 %v1771_v19  ;;  %v1574_v23 = vpack.c.bf16 %v568_v22, %v567_v21  ;;  %v744_v22 = vld [vmem:[#allocation6 + $0x160] sm:$0xff]  ;;  %v821_v27 = vld [vmem:[#allocation4 + $0x188] sm:$0xff] }
  0x7f   :  { %1536 = vmatpush3.bf16.msra.mxu0 %v1535_v28  ;;  %v645_v28 = vld [vmem:[#allocation4 + $0x110] sm:$0xff] }
  0x80   :  { %1537 = vmatprep.subr.bf16.mxu0 %v1771_v19 }
  0x83   :  { %1539 = vmatpush3.bf16.msra.mxu0 %v1538_v31  ;;  %v1583_v31 = vpack.c.bf16 %v646_v30, %v645_v28  ;;  %v822_v28 = vld [vmem:[#allocation4 + $0x190] sm:$0xff]  ;;  %v823_v30 = vld [vmem:[#allocation4 + $0x198] sm:$0xff] }
  0x84   :  { %1540 = vmatprep.subr.bf16.mxu0 %v1771_v19 }
  0x87   :  { %1542 = vmatpush3.bf16.msra.mxu0 %v1541_v34  ;;  %v1586_v34 = vpack.c.bf16 %v648_v33, %v647_v32  ;;  %v824_v32 = vld [vmem:[#allocation4 + $0x1a0] sm:$0xff]  ;;  %v825_v33 = vld [vmem:[#allocation4 + $0x1a8] sm:$0xff] }
  0x88   :  { %1543 = vmatprep.subr.bf16.mxu0 %v1771_v19 }
  0x8b   :  { %1545 = vmatpush3.bf16.msra.mxu0 %v1544_v37  ;;  %v1589_v37 = vpack.c.bf16 %v650_v36, %v649_v35  ;;  %v826_v35 = vld [vmem:[#allocation4 + $0x1b0] sm:$0xff]  ;;  %v827_v36 = vld [vmem:[#allocation4 + $0x1b8] sm:$0xff] }
  0x8c   :  { %1546 = vmatprep.subr.bf16.mxu0 %v1771_v19 }
  0x8f   :  { %1548 = vmatpush3.bf16.msra.mxu0 %v1547_v40  ;;  %v1592_v40 = vpack.c.bf16 %v652_v39, %v651_v38  ;;  %v828_v38 = vld [vmem:[#allocation4 + $0x1c0] sm:$0xff]  ;;  %v829_v39 = vld [vmem:[#allocation4 + $0x1c8] sm:$0xff] }
  0x90   :  { %1549 = vmatprep.subr.bf16.mxu0 %v1771_v19 }
  0x93   :  { %1551 = vmatpush3.bf16.msra.mxu0 %v1550_v43  ;;  %v1595_v43 = vpack.c.bf16 %v654_v42, %v653_v41  ;;  %v830_v41 = vld [vmem:[#allocation4 + $0x1d0] sm:$0xff]  ;;  %v831_v42 = vld [vmem:[#allocation4 + $0x1d8] sm:$0xff] }
  0x94   :  { %1552 = vmatprep.subr.bf16.mxu0 %v1771_v19 }
  0x97   :  { %1554 = vmatpush3.bf16.msra.mxu0 %v1553_v60  ;;  %v658_v60 = vld [vmem:[#allocation4 + $0x178] sm:$0xff] }
  0x98   :  { %1579 = vmatprep.subr.bf16.mxu0 %v1771_v19  ;;  %v1601_v61 = vpack.c.bf16 %v658_v60, %v657_v59  ;;  %v834_v59 = vld [vmem:[#allocation4 + $0x1f0] sm:$0xff]  ;;  %v835_v60 = vld [vmem:[#allocation4 + $0x1f8] sm:$0xff] }
 0x12d   :  { %v214_v44 = vpop.f32.mrb[0].mxu0 }
 0x12e   :  { %v1886_v45 = vpop.f32.mrb[1].mxu0  ;;  %v215_v51 = vadd.f32 %v214_v44, %v131_v50  ;;  %v655_v44 = vld [vmem:[#allocation4 + $0x160] sm:$0xff]  ;;  %v134_v50 = vsub.s32 1, %v1888_v47 }
 0x12f   :  { %v1598_v48 = vpack.c.bf16 %v656_v46, %v655_v44  ;;  %v832_v44 = vld [vmem:[#allocation4 + $0x1e0] sm:$0xff]  ;;  %v833_v46 = vld [vmem:[#allocation4 + $0x1e8] sm:$0xff] }
 0x132   :  { %v1899_v56 = vpop.f32.mrb[0].mxu1 }
 0x133   :  { %v1901_v57 = vpop.f32.mrb[1].mxu1 }
 0x14d   :  { %v372_v52 = vpop.f32.mrb[2].mxu0 }
 0x14e   :  { %v376_v53 = vadd.f32 %v372_v52, %v215_v51  ;;  %v1173_v54 = vpop.f32.mrb[3].mxu0  ;;  %v135_v51 = vrot.slane %v1894_v49, %v134_v50  ;;  %v138_v50 = vsub.s32 2, %v1888_v47 }
 0x150   :  { %1685 = vtanh.f32 %v376_v53  ;;  %v217_v52 = vadd.f32 %v1886_v45, %v135_v51  ;;  %v735_v45 = vld [vmem:[#allocation6 + $0x118] sm:$0xff]  ;;  %v139_v51 = vrot.slane %v1894_v49, %v138_v50 }
 0x15a   :  { %v1686_v55 = vpop.eup %1685 }
 0x15b   :  { %1207 = vmatmul.mubr.f32.vlgmr.msra.gmra.mrb[2].mxu1 %v1686_v55 }
 0x15c   :  { %1276 = vmatprep.mubr.msk.f32.mxu1 %vm1772_vm0, %v1770_v0  ;;  %1557 = vmatpush3.bf16.msra.mxu1 %v1556_v1  ;;  %v734_v1 = vld [vmem:[#allocation6 + $0x110] sm:$0xff] }
 0x15d   :  { %1558 = vmatprep.subr.bf16.mxu1 %v1771_v19 }
 0x160   :  { %1560 = vmatpush3.bf16.msra.mxu1 %v1559_v3  ;;  %v1607_v3 = vpack.c.bf16 %v735_v45, %v734_v1  ;;  %v911_v1 = vld [vmem:[#allocation6 + $0x190] sm:$0xff]  ;;  %v912_v45 = vld [vmem:[#allocation6 + $0x198] sm:$0xff] }
 0x161   :  { %1561 = vmatprep.subr.bf16.mxu1 %v1771_v19 }
 0x164   :  { %1563 = vmatpush3.bf16.msra.mxu1 %v1562_v6  ;;  %v1610_v6 = vpack.c.bf16 %v737_v5, %v736_v4  ;;  %v914_v4 = vld [vmem:[#allocation6 + $0x1a8] sm:$0xff] }
 0x165   :  { %1564 = vmatprep.subr.bf16.mxu1 %v1771_v19 }
 0x168   :  { %1566 = vmatpush3.bf16.msra.mxu1 %v1565_v9  ;;  %v1613_v9 = vpack.c.bf16 %v739_v8, %v738_v7  ;;  %v917_v8 = vld [vmem:[#allocation6 + $0x1c0] sm:$0xff] }
 0x169   :  { %1567 = vmatprep.subr.bf16.mxu1 %v1771_v19 }
 0x16c   :  { %1569 = vmatpush3.bf16.msra.mxu1 %v1568_v12  ;;  %v1616_v12 = vpack.c.bf16 %v741_v11, %v740_v10 }
 0x16d   :  { %1570 = vmatprep.subr.bf16.mxu1 %v1771_v19 }
 0x170   :  { %1572 = vmatpush3.bf16.msra.mxu1 %v1571_v20  ;;  %v743_v20 = vld [vmem:[#allocation6 + $0x158] sm:$0xff] }
 0x171   :  { %1573 = vmatprep.subr.bf16.mxu1 %v1771_v19  ;;  %v1619_v21 = vpack.c.bf16 %v743_v20, %v742_v18  ;;  %v920_v18 = vld [vmem:[#allocation6 + $0x1d8] sm:$0xff] }
 0x174   :  { %1575 = vmatpush3.bf16.msra.mxu1 %v1574_v23  ;;  %v745_v23 = vld [vmem:[#allocation6 + $0x168] sm:$0xff] }
 0x175   :  { %1576 = vmatprep.subr.bf16.mxu1 %v1771_v19 }
 0x22e   :  { %v460_v13 = vpop.f32.mrb[2].mxu1 }
 0x22f   :  { %v1910_v14 = vadd.f32 %v460_v13, %v1850_v17  ;;  %v1208_v15 = vpop.f32.mrb[3].mxu1  ;;  %v1577_v17 = vpack.c.bf16 %v570_v25, %v569_v24  ;;  %v1622_v24 = vpack.c.bf16 %v745_v23, %v744_v22  ;;  %v746_v25 = vld [vmem:[#allocation6 + $0x170] sm:$0xff]  ;;  %v922_v22 = vld [vmem:[#allocation6 + $0x1e8] sm:$0xff] }
 0x231   :  { %1242 = vmatmul.mubr.f32.vlgmr.msra.gmra.mrb[4].mxu0 %v1910_v14  ;;  %1578 = vmatpush3.bf16.msra.mxu1 %v1577_v17  ;;  %v747_v17 = vld [vmem:[#allocation6 + $0x178] sm:$0xff] }
 0x232   :  { %1311 = vmatprep.mubr.msk.f32.mxu0 %vm1772_vm0, %v1770_v0  ;;  %1603 = vmatprep.subr.bf16.mxu1 %v1771_v19 }
 0x233   :  { %1581 = vmatpush3.bf16.msra.mxu0 %v1580_v29  ;;  %v1628_v29 = vpack.c.bf16 %v821_v27, %v820_v26 }
 0x234   :  { %1582 = vmatprep.subr.bf16.mxu0 %v1771_v19 }
 0x237   :  { %1584 = vmatpush3.bf16.msra.mxu0 %v1583_v31  ;;  %v1631_v31 = vpack.c.bf16 %v823_v30, %v822_v28 }
 0x238   :  { %1585 = vmatprep.subr.bf16.mxu0 %v1771_v19 }
 0x23b   :  { %1587 = vmatpush3.bf16.msra.mxu0 %v1586_v34  ;;  %v1634_v34 = vpack.c.bf16 %v825_v33, %v824_v32 }
 0x23c   :  { %1588 = vmatprep.subr.bf16.mxu0 %v1771_v19 }
 0x23f   :  { %1590 = vmatpush3.bf16.msra.mxu0 %v1589_v37  ;;  %v1637_v37 = vpack.c.bf16 %v827_v36, %v826_v35 }
 0x240   :  { %1591 = vmatprep.subr.bf16.mxu0 %v1771_v19 }
 0x243   :  { %1593 = vmatpush3.bf16.msra.mxu0 %v1592_v40  ;;  %v1640_v40 = vpack.c.bf16 %v829_v39, %v828_v38 }
 0x244   :  { %1594 = vmatprep.subr.bf16.mxu0 %v1771_v19 }
 0x247   :  { %1596 = vmatpush3.bf16.msra.mxu0 %v1595_v43  ;;  %v1643_v43 = vpack.c.bf16 %v831_v42, %v830_v41 }
 0x248   :  { %1597 = vmatprep.subr.bf16.mxu0 %v1771_v19 }
 0x24b   :  { %1599 = vmatpush3.bf16.msra.mxu0 %v1598_v48  ;;  %v1646_v48 = vpack.c.bf16 %v833_v46, %v832_v44 }
 0x24c   :  { %1600 = vmatprep.subr.bf16.mxu0 %v1771_v19 }
 0x24f   :  { %1602 = vmatpush3.bf16.msra.mxu0 %v1601_v61  ;;  %v1649_v61 = vpack.c.bf16 %v835_v60, %v834_v59 }
 0x250   :  { %1627 = vmatprep.subr.bf16.mxu0 %v1771_v19 }
 0x304   :  { %v548_v53 = vpop.f32.mrb[4].mxu0 }
 0x305   :  { %v552_v54 = vadd.f32 %v548_v53, %v217_v52  ;;  %v1243_v55 = vpop.f32.mrb[5].mxu0  ;;  %v286_v52 = vadd.f32 %v1899_v56, %v139_v51  ;;  %v1655_v56 = vpack.c.bf16 %v912_v45, %v911_v1 }
 0x307   :  { %1687 = vtanh.f32 %v552_v54 }
 0x311   :  { %v1688_v58 = vpop.eup %1687 }
 0x312   :  { %1277 = vmatmul.mubr.f32.vlgmr.msra.gmra.mrb[4].mxu1 %v1688_v58 }
 0x313   :  { %1346 = vmatprep.mubr.msk.f32.mxu1 %vm1772_vm0, %v1770_v0  ;;  %1605 = vmatpush3.bf16.msra.mxu1 %v1604_v2  ;;  %v1652_v2 = vpack.c.bf16 %v910_v63, %v909_v62 }
 0x314   :  { %1606 = vmatprep.subr.bf16.mxu1 %v1771_v19 }
 0x317   :  { %1608 = vmatpush3.bf16.msra.mxu1 %v1607_v3  ;;  %v913_v3 = vld [vmem:[#allocation6 + $0x1a0] sm:$0xff] }
 0x318   :  { %1609 = vmatprep.subr.bf16.mxu1 %v1771_v19  ;;  %v1658_v5 = vpack.c.bf16 %v914_v4, %v913_v3 }
 0x31b   :  { %1611 = vmatpush3.bf16.msra.mxu1 %v1610_v6  ;;  %v916_v6 = vld [vmem:[#allocation6 + $0x1b8] sm:$0xff] }
 0x31c   :  { %1612 = vmatprep.subr.bf16.mxu1 %v1771_v19 }
 0x31f   :  { %1614 = vmatpush3.bf16.msra.mxu1 %v1613_v9  ;;  %v918_v9 = vld [vmem:[#allocation6 + $0x1c8] sm:$0xff] }
 0x320   :  { %1615 = vmatprep.subr.bf16.mxu1 %v1771_v19  ;;  %v1664_v10 = vpack.c.bf16 %v918_v9, %v917_v8 }
 0x323   :  { %1617 = vmatpush3.bf16.msra.mxu1 %v1616_v12 }
 0x324   :  { %1618 = vmatprep.subr.bf16.mxu1 %v1771_v19 }
 0x327   :  { %1620 = vmatpush3.bf16.msra.mxu1 %v1619_v21  ;;  %v921_v21 = vld [vmem:[#allocation6 + $0x1e0] sm:$0xff] }
 0x328   :  { %1621 = vmatprep.subr.bf16.mxu1 %v1771_v19  ;;  %v1670_v23 = vpack.c.bf16 %v922_v22, %v921_v21 }
 0x32b   :  { %1623 = vmatpush3.bf16.msra.mxu1 %v1622_v24  ;;  %v923_v24 = vld [vmem:[#allocation6 + $0x1f0] sm:$0xff] }
 0x32c   :  { %1624 = vmatprep.subr.bf16.mxu1 %v1771_v19 }
 0x3e5   :  { %v637_v13 = vpop.f32.mrb[4].mxu1 }
 0x3e6   :  { %v1937_v15 = vadd.f32 %v637_v13, %v1910_v14  ;;  %v1278_v16 = vpop.f32.mrb[5].mxu1  ;;  %v1625_v14 = vpack.c.bf16 %v747_v17, %v746_v25  ;;  %v924_v25 = vld [vmem:[#allocation6 + $0x1f8] sm:$0xff] }
 0x3e7   :  { %v919_v16 = vld [vmem:[#allocation6 + $0x1d0] sm:$0xff]  ;;  %v1673_v17 = vpack.c.bf16 %v924_v25, %v923_v24 }
 0x3e8   :  { %1312 = vmatmul.mubr.f32.vlgmr.msra.gmra.mrb[6].mxu0 %v1937_v15  ;;  %1626 = vmatpush3.bf16.msra.mxu1 %v1625_v14  ;;  %v1667_v20 = vpack.c.bf16 %v920_v18, %v919_v16 }
 0x3e9   :  { %1381 = vmatprep.mubr.msk.f32.mxu0 %vm1772_vm0, %v1770_v0  ;;  %1651 = vmatprep.subr.bf16.mxu1 %v1771_v19 }
 0x3ea   :  { %1629 = vmatpush3.bf16.msra.mxu0 %v1628_v29 }
 0x3eb   :  { %1630 = vmatprep.subr.bf16.mxu0 %v1771_v19 }
 0x3ee   :  { %1632 = vmatpush3.bf16.msra.mxu0 %v1631_v31 }
 0x3ef   :  { %1633 = vmatprep.subr.bf16.mxu0 %v1771_v19 }
 0x3f2   :  { %1635 = vmatpush3.bf16.msra.mxu0 %v1634_v34 }
 0x3f3   :  { %1636 = vmatprep.subr.bf16.mxu0 %v1771_v19 }
 0x3f6   :  { %1638 = vmatpush3.bf16.msra.mxu0 %v1637_v37 }
 0x3f7   :  { %1639 = vmatprep.subr.bf16.mxu0 %v1771_v19 }
 0x3fa   :  { %1641 = vmatpush3.bf16.msra.mxu0 %v1640_v40 }
 0x3fb   :  { %1642 = vmatprep.subr.bf16.mxu0 %v1771_v19 }
 0x3fe   :  { %1644 = vmatpush3.bf16.msra.mxu0 %v1643_v43 }
 0x3ff   :  { %1645 = vmatprep.subr.bf16.mxu0 %v1771_v19 }
 0x402   :  { %1647 = vmatpush3.bf16.msra.mxu0 %v1646_v48 }
 0x403   :  { %1648 = vmatprep.subr.bf16.mxu0 %v1771_v19 }
 0x406   :  { %1650 = vmatpush3.bf16.msra.mxu0 %v1649_v61 }
 0x4bb   :  { %v725_v53 = vpop.f32.mrb[6].mxu0 }
 0x4bc   :  { %v729_v54 = vadd.f32 %v725_v53, %v286_v52  ;;  %v1313_v55 = vpop.f32.mrb[7].mxu0 }
 0x4be   :  { %1689 = vtanh.f32 %v729_v54 }
 0x4c8   :  { %v1690_v58 = vpop.eup %1689 }
 0x4c9   :  { %1347 = vmatmul.mubr.f32.vlgmr.msra.gmra.mrb[6].mxu1 %v1690_v58 }
 0x4ca   :  { %1416 = vmatprep.mubr.msk.f32.mxu1 %vm1772_vm0, %v1770_v0  ;;  %1653 = vmatpush3.bf16.msra.mxu1 %v1652_v2  ;;  %v915_v0 = vld [vmem:[#allocation6 + $0x1b0] sm:$0xff] }
 0x4cb   :  { %1654 = vmatprep.subr.bf16.mxu1 %v1771_v19  ;;  %v1661_v7 = vpack.c.bf16 %v916_v6, %v915_v0 }
 0x4ce   :  { %1656 = vmatpush3.bf16.msra.mxu1 %v1655_v56 }
 0x4cf   :  { %1657 = vmatprep.subr.bf16.mxu1 %v1771_v19 }
 0x4d2   :  { %1659 = vmatpush3.bf16.msra.mxu1 %v1658_v5 }
 0x4d3   :  { %1660 = vmatprep.subr.bf16.mxu1 %v1771_v19 }
 0x4d6   :  { %1662 = vmatpush3.bf16.msra.mxu1 %v1661_v7 }
 0x4d7   :  { %1663 = vmatprep.subr.bf16.mxu1 %v1771_v19 }
 0x4da   :  { %1665 = vmatpush3.bf16.msra.mxu1 %v1664_v10 }
 0x4db   :  { %1666 = vmatprep.subr.bf16.mxu1 %v1771_v19 }
 0x4de   :  { %1668 = vmatpush3.bf16.msra.mxu1 %v1667_v20 }
 0x4df   :  { %1669 = vmatprep.subr.bf16.mxu1 %v1771_v19 }
 0x4e2   :  { %1671 = vmatpush3.bf16.msra.mxu1 %v1670_v23 }
 0x4e3   :  { %1672 = vmatprep.subr.bf16.mxu1 %v1771_v19 }
 0x4e6   :  { %1674 = vmatpush3.bf16.msra.mxu1 %v1673_v17 }
 0x59c   :  { %v814_v11 = vpop.f32.mrb[6].mxu1 }
 0x59d   :  { %v818_v12 = vadd.f32 %v814_v11, %v1937_v15  ;;  %v1348_v13 = vpop.f32.mrb[7].mxu1  ;;  %v142_v15 = vsub.s32 3, %v1888_v47 }
 0x59f   :  { %1382 = vmatmul.mubr.f32.vlgmr.msra.gmra.mrb[8].mxu0 %v818_v12  ;;  %v143_v14 = vrot.slane %v1894_v49, %v142_v15 }
 0x5a1   :  { %v288_v26 = vadd.f32 %v1901_v57, %v143_v14 }
 0x672   :  { %v902_v27 = vpop.f32.mrb[8].mxu0 }
 0x673   :  { %v906_v28 = vadd.f32 %v902_v27, %v288_v26  ;;  %v1383_v29 = vpop.f32.mrb[9].mxu0 }
 0x675   :  { %1691 = vtanh.f32 %v906_v28 }
 0x67f   :  { %v1692_v30 = vpop.eup %1691 }
 0x680   :  { %1417 = vmatmul.mubr.f32.vlgmr.msra.gmra.mrb[8].mxu1 %v1692_v30 }
 0x753   :  { %v991_v31 = vpop.f32.mrb[8].mxu1 }
 0x754   :  { %v995_v32 = vadd.f32 %v991_v31, %v818_v12  ;;  %v1418_v33 = vpop.f32.mrb[9].mxu1 }
 0x756   :  { %996 = vst [vmem:[%s1976_s5] sm:$0x1] %v995_v32 }
 0x757   :  { %1001 = vsyncpa [#allocation3], 1 }
 0x758   :  { %1002 = vsyncpa [#allocation5], 1 }

</bundles_post_ra>
